<compile_context>
chip_gen: v7x
topology: tpu7x:2x2x1
jax: 0.10.0
libtpu: 0.0.40
codegen_flags: <defaults>
</compile_context>

<pallas_src>
import math
import functools

import numpy as np
import jax
import jax.numpy as jnp
from jax.experimental import pallas as pl
from jax.experimental.pallas import tpu as pltpu


def _gaussian_1d(window_size: int, sigma: float = 1.5) -> np.ndarray:
    """Same formula as the PyTorch `gaussian` helper, trace-time constant."""
    g = np.array(
        [math.exp(-((x - window_size // 2) ** 2) / float(2 * sigma ** 2))
         for x in range(window_size)],
        dtype=np.float64,
    )
    return (g / g.sum()).astype(np.float32)


def _band_matrix(n_in: int, g: np.ndarray) -> np.ndarray:
    """(n_out, n_in) banded matrix M so that M @ x == valid 1-D conv of x with g."""
    ws = g.shape[0]
    n_out = n_in - ws + 1
    m = np.zeros((n_out, n_in), dtype=np.float32)
    for i in range(n_out):
        m[i, i:i + ws] = g
    return m


def _ssim_kernel(c_ref, gr_ref, gc_ref, img1_ref, img2_ref, out_ref, acc_ref,
                 *, inv_total: float):
    # c_ref   : SMEM (1, 2) f32  -> (C1, C2), computed from the global dynamic range
    # gr_ref  : VMEM (OH, H) f32 -> row-pass Gaussian Toeplitz matrix (constant)
    # gc_ref  : VMEM (W, OW) f32 -> col-pass Gaussian Toeplitz matrix (constant)
    # img1/2  : VMEM (1, H, W)   -> one (batch, channel) slice per grid step
    # out_ref : SMEM (1, 1) f32  -> final loss = 1 - mean(ssim_map)
    # acc_ref : VMEM (OH, OW) f32 scratch, persistent across grid iterations
    i = pl.program_id(0)

    @pl.when(i == 0)
    def _():
        acc_ref[...] = jnp.zeros_like(acc_ref)

    c1 = c_ref[0, 0]
    c2 = c_ref[0, 1]
    gr = gr_ref[...]                        # (OH, H)
    gc = gc_ref[...]                        # (W, OW)
    x1 = img1_ref[0].astype(jnp.float32)    # (H, W)
    x2 = img2_ref[0].astype(jnp.float32)

    def gauss(x):
        # Separable valid conv as two MXU matmuls with f32 accumulation.
        t = jnp.dot(gr, x, preferred_element_type=jnp.float32)    # (OH, W)
        return jnp.dot(t, gc, preferred_element_type=jnp.float32)  # (OH, OW)

    mu1 = gauss(x1)
    mu2 = gauss(x2)
    e11 = gauss(x1 * x1)
    e22 = gauss(x2 * x2)
    e12 = gauss(x1 * x2)

    mu1_sq = mu1 * mu1
    mu2_sq = mu2 * mu2
    mu1_mu2 = mu1 * mu2
    sigma1_sq = e11 - mu1_sq
    sigma2_sq = e22 - mu2_sq
    sigma12 = e12 - mu1_mu2

    v1 = 2.0 * sigma12 + c2
    v2 = sigma1_sq + sigma2_sq + c2
    ssim_map = ((2.0 * mu1_mu2 + c1) * v1) / ((mu1_sq + mu2_sq + c1) * v2)

    # Elementwise accumulation across channels; reduce to a scalar only once,
    # on the final grid step.
    acc_ref[...] += ssim_map

    @pl.when(i == pl.num_programs(0) - 1)
    def _():
        out_ref[0, 0] = 1.0 - jnp.sum(acc_ref[...]) * inv_total


def ssim_loss(img1: jnp.ndarray, img2: jnp.ndarray,
              window_size: int = 11, sigma: float = 1.5):
    """img1, img2: (B, C, H, W). Returns scalar 1 - SSIM (size_average=True)."""
    assert img1.shape == img2.shape and img1.ndim == 4
    B, C, H, W = img1.shape
    ws = min(window_size, H, W)             # real_size clamp (matches reference)
    OH, OW = H - ws + 1, W - ws + 1

    g = _gaussian_1d(ws, sigma)
    gr = jnp.asarray(_band_matrix(H, g))        # (OH, H)
    gc = jnp.asarray(_band_matrix(W, g).T)      # (W, OW)

    # Global dynamic-range prepass (val_range=None path of the reference).
    # Done in plain JAX so L / C1 / C2 stay global once the kernel is tiled.
    max_val = jnp.where(jnp.max(img1) > 128.0, 255.0, 1.0)
    min_val = jnp.where(jnp.min(img1) < -0.5, -1.0, 0.0)
    L = (max_val - min_val).astype(jnp.float32)
    c1c2 = jnp.stack([(0.01 * L) ** 2, (0.03 * L) ** 2]).reshape(1, 2)
    c1c2 = c1c2.astype(jnp.float32)

    n_blocks = B * C
    x1 = img1.reshape(n_blocks, H, W)   # keep native dtype; upcast in-kernel
    x2 = img2.reshape(n_blocks, H, W)

    kernel = functools.partial(
        _ssim_kernel, inv_total=1.0 / float(n_blocks * OH * OW))

    out = pl.pallas_call(
        kernel,
        out_shape=jax.ShapeDtypeStruct((1, 1), jnp.float32),
        grid_spec=pltpu.PrefetchScalarGridSpec(
            num_scalar_prefetch=0,
            grid=(n_blocks,),
            in_specs=[
                pl.BlockSpec(memory_space=pltpu.MemorySpace.SMEM),   # C1, C2
                pl.BlockSpec((OH, H), lambda i: (0, 0)),             # row Toeplitz
                pl.BlockSpec((W, OW), lambda i: (0, 0)),             # col Toeplitz
                pl.BlockSpec((1, H, W), lambda i: (i, 0, 0)),        # img1 channel
                pl.BlockSpec((1, H, W), lambda i: (i, 0, 0)),        # img2 channel
            ],
            out_specs=pl.BlockSpec(memory_space=pltpu.MemorySpace.SMEM),
            scratch_shapes=[pltpu.VMEM((OH, OW), jnp.float32)],
        ),
        compiler_params=pltpu.CompilerParams(
            dimension_semantics=("arbitrary",)),   # running-sum reduction axis
    )(c1c2, gr, gc, x1, x2)
    return out[0, 0]


def perceptual_loss(y: jnp.ndarray, y_: jnp.ndarray, layer_indexs=(3,)):
    # TODO(synk): pretrained VGG16 feature extraction (get_feature_module) is not
    # reproducible in a self-contained script; the SSIM loss_func is applied to
    # the raw inputs for each requested layer index.
    loss = jnp.float32(0.0)
    for _ in layer_indexs:
        loss = loss + ssim_loss(y, y_)
    return loss


if __name__ == "__main__":
    key = jax.random.PRNGKey(0)
    k1, k2 = jax.random.split(key)
    B, C, H, W = 2, 3, 16, 16
    img1 = jax.random.uniform(k1, (B, C, H, W), dtype=jnp.float32)
    img2 = jax.random.uniform(k2, (B, C, H, W), dtype=jnp.float32)

    loss = perceptual_loss(img1, img2, layer_indexs=(3,))
    jax.block_until_ready(loss)
    print("KERNEL_OK")
</pallas_src>

<mosaic_0001>
module attributes {stable_mosaic.version = 11 : i64} {
  func.func @_ssim_kernel(%arg0: i32, %arg1: memref<1x2xf32, #tpu.memory_space<smem>>, %arg2: memref<6x16xf32, #tpu.memory_space<vmem>>, %arg3: memref<16x6xf32, #tpu.memory_space<vmem>>, %arg4: memref<1x16x16xf32, #tpu.memory_space<vmem>>, %arg5: memref<1x16x16xf32, #tpu.memory_space<vmem>>, %arg6: memref<1x1xf32, #tpu.memory_space<smem>>, %arg7: memref<6x6xf32, #tpu.memory_space<vmem>>) attributes {dimension_semantics = [#tpu.dimension_semantics<arbitrary>], iteration_bounds = array<i64: 6>, scalar_prefetch = 0 : i64, scratch_operands = 1 : i64, tpu.core_type = #tpu.core_type<tc>, window_params = [{transform_indices = @transform_0, window_bounds = array<i64: 1, 2>}, {pipeline_mode = #tpu.pipeline_mode<synchronous>, transform_indices = @transform_1, window_bounds = array<i64: 6, 16>}, {pipeline_mode = #tpu.pipeline_mode<synchronous>, transform_indices = @transform_2, window_bounds = array<i64: 16, 6>}, {transform_indices = @transform_3, window_bounds = array<i64: 1, 16, 16>}, {transform_indices = @transform_4, window_bounds = array<i64: 1, 16, 16>}, {transform_indices = @transform_5, window_bounds = array<i64: 1, 1>}]} {
    %c0_i32 = arith.constant 0 : i32
    %0 = arith.cmpi eq, %arg0, %c0_i32 : i32
    %1 = arith.extui %0 : i1 to i32
    %c0_i32_0 = arith.constant 0 : i32
    %2 = arith.cmpi ne, %1, %c0_i32_0 : i32
    scf.if %2 {
      %cst_29 = arith.constant 0.000000e+00 : f32
      %53 = vector.broadcast %cst_29 : f32 to vector<6x6xf32>
      %c0_30 = arith.constant 0 : index
      %c0_31 = arith.constant 0 : index
      %54 = vector.load %arg7[%c0_30, %c0_31] : memref<6x6xf32, #tpu.memory_space<vmem>>, vector<6x6xf32>
      tpu.vector_store %arg7[%c0_30, %c0_31], %53 {strides = array<i32>} : memref<6x6xf32, #tpu.memory_space<vmem>>, vector<6x6xf32>,
    } else {
    }
    %c0 = arith.constant 0 : index
    %c0_1 = arith.constant 0 : index
    %3 = memref.load %arg1[%c0, %c0_1] : memref<1x2xf32, #tpu.memory_space<smem>>
    %c0_2 = arith.constant 0 : index
    %c1 = arith.constant 1 : index
    %4 = memref.load %arg1[%c0_2, %c1] : memref<1x2xf32, #tpu.memory_space<smem>>
    %c0_3 = arith.constant 0 : index
    %c0_4 = arith.constant 0 : index
    %5 = vector.load %arg2[%c0_3, %c0_4] : memref<6x16xf32, #tpu.memory_space<vmem>>, vector<6x16xf32>
    %c0_5 = arith.constant 0 : index
    %c0_6 = arith.constant 0 : index
    %6 = vector.load %arg3[%c0_5, %c0_6] : memref<16x6xf32, #tpu.memory_space<vmem>>, vector<16x6xf32>
    %c0_7 = arith.constant 0 : index
    %c0_8 = arith.constant 0 : index
    %c0_9 = arith.constant 0 : index
    %7 = vector.load %arg4[%c0_7, %c0_8, %c0_9] : memref<1x16x16xf32, #tpu.memory_space<vmem>>, vector<1x16x16xf32>
    %8 = vector.shape_cast %7 : vector<1x16x16xf32> to vector<16x16xf32>
    %c0_10 = arith.constant 0 : index
    %c0_11 = arith.constant 0 : index
    %c0_12 = arith.constant 0 : index
    %9 = vector.load %arg5[%c0_10, %c0_11, %c0_12] : memref<1x16x16xf32, #tpu.memory_space<vmem>>, vector<1x16x16xf32>
    %10 = vector.shape_cast %9 : vector<1x16x16xf32> to vector<16x16xf32>
    %cst = arith.constant dense<0.000000e+00> : vector<6x16xf32>
    %11 = tpu.matmul %5, %8, %cst {dimension_numbers = #tpu.dot_dimension_numbers<[1], [0], [0], [1], [0, 0, 1, 1], [], []>} : vector<6x16xf32>, vector<16x16xf32>, vector<6x16xf32> -> vector<6x16xf32>
    %cst_13 = arith.constant dense<0.000000e+00> : vector<6x6xf32>
    %12 = tpu.matmul %11, %6, %cst_13 {dimension_numbers = #tpu.dot_dimension_numbers<[1], [0], [0], [1], [0, 0, 1, 1], [], []>} : vector<6x16xf32>, vector<16x6xf32>, vector<6x6xf32> -> vector<6x6xf32>
    %cst_14 = arith.constant dense<0.000000e+00> : vector<6x16xf32>
    %13 = tpu.matmul %5, %10, %cst_14 {dimension_numbers = #tpu.dot_dimension_numbers<[1], [0], [0], [1], [0, 0, 1, 1], [], []>} : vector<6x16xf32>, vector<16x16xf32>, vector<6x16xf32> -> vector<6x16xf32>
    %cst_15 = arith.constant dense<0.000000e+00> : vector<6x6xf32>
    %14 = tpu.matmul %13, %6, %cst_15 {dimension_numbers = #tpu.dot_dimension_numbers<[1], [0], [0], [1], [0, 0, 1, 1], [], []>} : vector<6x16xf32>, vector<16x6xf32>, vector<6x6xf32> -> vector<6x6xf32>
    %15 = arith.mulf %8, %8 : vector<16x16xf32>
    %cst_16 = arith.constant dense<0.000000e+00> : vector<6x16xf32>
    %16 = tpu.matmul %5, %15, %cst_16 {dimension_numbers = #tpu.dot_dimension_numbers<[1], [0], [0], [1], [0, 0, 1, 1], [], []>} : vector<6x16xf32>, vector<16x16xf32>, vector<6x16xf32> -> vector<6x16xf32>
    %cst_17 = arith.constant dense<0.000000e+00> : vector<6x6xf32>
    %17 = tpu.matmul %16, %6, %cst_17 {dimension_numbers = #tpu.dot_dimension_numbers<[1], [0], [0], [1], [0, 0, 1, 1], [], []>} : vector<6x16xf32>, vector<16x6xf32>, vector<6x6xf32> -> vector<6x6xf32>
    %18 = arith.mulf %10, %10 : vector<16x16xf32>
    %cst_18 = arith.constant dense<0.000000e+00> : vector<6x16xf32>
    %19 = tpu.matmul %5, %18, %cst_18 {dimension_numbers = #tpu.dot_dimension_numbers<[1], [0], [0], [1], [0, 0, 1, 1], [], []>} : vector<6x16xf32>, vector<16x16xf32>, vector<6x16xf32> -> vector<6x16xf32>
    %cst_19 = arith.constant dense<0.000000e+00> : vector<6x6xf32>
    %20 = tpu.matmul %19, %6, %cst_19 {dimension_numbers = #tpu.dot_dimension_numbers<[1], [0], [0], [1], [0, 0, 1, 1], [], []>} : vector<6x16xf32>, vector<16x6xf32>, vector<6x6xf32> -> vector<6x6xf32>
    %21 = arith.mulf %8, %10 : vector<16x16xf32>
    %cst_20 = arith.constant dense<0.000000e+00> : vector<6x16xf32>
    %22 = tpu.matmul %5, %21, %cst_20 {dimension_numbers = #tpu.dot_dimension_numbers<[1], [0], [0], [1], [0, 0, 1, 1], [], []>} : vector<6x16xf32>, vector<16x16xf32>, vector<6x16xf32> -> vector<6x16xf32>
    %cst_21 = arith.constant dense<0.000000e+00> : vector<6x6xf32>
    %23 = tpu.matmul %22, %6, %cst_21 {dimension_numbers = #tpu.dot_dimension_numbers<[1], [0], [0], [1], [0, 0, 1, 1], [], []>} : vector<6x16xf32>, vector<16x6xf32>, vector<6x6xf32> -> vector<6x6xf32>
    %24 = arith.mulf %12, %12 : vector<6x6xf32>
    %25 = arith.mulf %14, %14 : vector<6x6xf32>
    %26 = arith.mulf %12, %14 : vector<6x6xf32>
    %27 = arith.subf %17, %24 : vector<6x6xf32>
    %28 = arith.subf %20, %25 : vector<6x6xf32>
    %29 = arith.subf %23, %26 : vector<6x6xf32>
    %cst_22 = arith.constant 2.000000e+00 : f32
    %30 = vector.broadcast %cst_22 : f32 to vector<6x6xf32>
    %31 = arith.mulf %30, %29 : vector<6x6xf32>
    %32 = vector.broadcast %4 : f32 to vector<6x6xf32>
    %33 = arith.addf %31, %32 : vector<6x6xf32>
    %34 = arith.addf %27, %28 : vector<6x6xf32>
    %35 = vector.broadcast %4 : f32 to vector<6x6xf32>
    %36 = arith.addf %34, %35 : vector<6x6xf32>
    %cst_23 = arith.constant 2.000000e+00 : f32
    %37 = vector.broadcast %cst_23 : f32 to vector<6x6xf32>
    %38 = arith.mulf %37, %26 : vector<6x6xf32>
    %39 = vector.broadcast %3 : f32 to vector<6x6xf32>
    %40 = arith.addf %38, %39 : vector<6x6xf32>
    %41 = arith.mulf %40, %33 : vector<6x6xf32>
    %42 = arith.addf %24, %25 : vector<6x6xf32>
    %43 = vector.broadcast %3 : f32 to vector<6x6xf32>
    %44 = arith.addf %42, %43 : vector<6x6xf32>
    %45 = arith.mulf %44, %36 : vector<6x6xf32>
    %46 = arith.divf %41, %45 : vector<6x6xf32>
    %c0_24 = arith.constant 0 : index
    %c0_25 = arith.constant 0 : index
    %47 = vector.load %arg7[%c0_24, %c0_25] : memref<6x6xf32, #tpu.memory_space<vmem>>, vector<6x6xf32>
    %48 = arith.addf %47, %46 : vector<6x6xf32>
    %c0_26 = arith.constant 0 : index
    %c0_27 = arith.constant 0 : index
    %49 = vector.load %arg7[%c0_26, %c0_27] : memref<6x6xf32, #tpu.memory_space<vmem>>, vector<6x6xf32>
    tpu.vector_store %arg7[%c0_26, %c0_27], %48 {strides = array<i32>} : memref<6x6xf32, #tpu.memory_space<vmem>>, vector<6x6xf32>,
    %c5_i32 = arith.constant 5 : i32
    %50 = arith.cmpi eq, %arg0, %c5_i32 : i32
    %51 = arith.extui %50 : i1 to i32
    %c0_i32_28 = arith.constant 0 : i32
    %52 = arith.cmpi ne, %51, %c0_i32_28 : i32
    scf.if %52 {
      %c0_29 = arith.constant 0 : index
      %c0_30 = arith.constant 0 : index
      %53 = vector.load %arg7[%c0_29, %c0_30] : memref<6x6xf32, #tpu.memory_space<vmem>>, vector<6x6xf32>
      %54 = vector.shape_cast %53 : vector<6x6xf32> to vector<1x6x6xf32>
      %cst_31 = arith.constant dense<0.000000e+00> : vector<1xf32>
      %55 = vector.multi_reduction <add>, %54, %cst_31 [1, 2] : vector<1x6x6xf32> to vector<1xf32>
      %56 = vector.shape_cast %55 : vector<1xf32> to vector<1x1x1xf32>
      %57 = vector.extract %56[0, 0, 0] : f32 from vector<1x1x1xf32>
      %cst_32 = arith.constant 0.00462962966 : f32
      %58 = arith.mulf %57, %cst_32 : f32
      %cst_33 = arith.constant 1.000000e+00 : f32
      %59 = arith.subf %cst_33, %58 : f32
      %c0_34 = arith.constant 0 : index
      %c0_35 = arith.constant 0 : index
      %60 = memref.load %arg6[%c0_34, %c0_35] : memref<1x1xf32, #tpu.memory_space<smem>>
      memref.store %59, %arg6[%c0_34, %c0_35] : memref<1x1xf32, #tpu.memory_space<smem>>
    } else {
    }
    return
  }
  func.func @transform_0(%arg0: i32) -> (i32, i32) {
    %c0_i32 = arith.constant 0 : i32
    %c0_i32_0 = arith.constant 0 : i32
    %c0_i32_1 = arith.constant 0 : i32
    return %c0_i32, %c0_i32_0 : i32, i32
  }
  func.func @transform_1(%arg0: i32) -> (i32, i32) {
    %c0_i32 = arith.constant 0 : i32
    %c0_i32_0 = arith.constant 0 : i32
    %c0_i32_1 = arith.constant 0 : i32
    return %c0_i32, %c0_i32_0 : i32, i32
  }
  func.func @transform_2(%arg0: i32) -> (i32, i32) {
    %c0_i32 = arith.constant 0 : i32
    %c0_i32_0 = arith.constant 0 : i32
    %c0_i32_1 = arith.constant 0 : i32
    return %c0_i32, %c0_i32_0 : i32, i32
  }
  func.func @transform_3(%arg0: i32) -> (i32, i32, i32) {
    %c0_i32 = arith.constant 0 : i32
    %c0_i32_0 = arith.constant 0 : i32
    %c0_i32_1 = arith.constant 0 : i32
    return %arg0, %c0_i32, %c0_i32_0 : i32, i32, i32
  }
  func.func @transform_4(%arg0: i32) -> (i32, i32, i32) {
    %c0_i32 = arith.constant 0 : i32
    %c0_i32_0 = arith.constant 0 : i32
    %c0_i32_1 = arith.constant 0 : i32
    return %arg0, %c0_i32, %c0_i32_0 : i32, i32, i32
  }
  func.func @transform_5(%arg0: i32) -> (i32, i32) {
    %c0_i32 = arith.constant 0 : i32
    %c0_i32_0 = arith.constant 0 : i32
    %c0_i32_1 = arith.constant 0 : i32
    return %c0_i32, %c0_i32_0 : i32, i32
  }
}

</mosaic_0001>

<bundles_post_ra>
// kernel: tpu_custom_call.1
= control target key start
LH: loop header
LB: loop body
LE: loop exit
PB: predicated region body
PF: predicated region fallthrough
CT: control target
= control target key end

     0   :  { %10 = vsyncpa [#allocation6], 0  ;;  %s1803_s0 = inlined_call_operand.vmem [shape: f32[1,2], index: 0, kind: input, shape index: {}]   ;;  %s1804_s1 = inlined_call_operand.vmem [shape: f32[6,16], index: 1, kind: input, shape index: {}]   ;;  %s1805_s2 = inlined_call_operand.vmem [shape: f32[16,6], index: 2, kind: input, shape index: {}]   ;;  %s1806_s3 = inlined_call_operand.hbm [shape: f32[6,16,16], index: 3, kind: input, shape index: {}]   ;;  %s1807_s4 = inlined_call_operand.hbm [shape: f32[6,16,16], index: 4, kind: input, shape index: {}]   ;;  %s1808_s5 = inlined_call_operand.hbm [shape: f32[1,1], index: 5, kind: output, shape index: {}]  }
   0x1   :  { %11 = vsyncpa [#allocation4], 0 }
   0x2   :  { %13 = vsyncpa [#allocation4 + $0x1], 0 }
   0x3   :  { %14 = vsyncpa [#allocation9], 0 }
   0x4   :  { %16 = vsyncpa [#allocation9 + $0x1], 0 }
   0x5   :  { %17 = vsyncpa [#allocation5], 0  ;;  %s1569_s18 = smov 0   ;;  %s1571_s19 = smov 0  }
   0x6   :  { %s1573_s20 = smov 0   ;;  %s1575_s21 = smov 0  }
   0x7 LB: > { %s1588_s22 = sadd.s32 4294967295, %s1527_s21   ;;  %s1591_s23 = sadd.s32 1, %s1527_s21   ;;  %s1527_s21 = sphi %s1575_s21, %s1823_s21   ;;  %s1523_s20 = sphi %s1573_s20, %s1822_s20   ;;  %s1519_s19 = sphi %s1571_s19, %s1821_s19   ;;  %s1515_s18 = sphi %s1569_s18, %s1820_s18  }
   0x8   : > { %s90_s24 = ssub.s32 %s1527_s21, %s1591_s23  ;;  %s93_s25 = sadd.s32 1, %s1523_s20 }
   0x9   : > { %p91_p0 = scmp.eq.s32.totalorder %s90_s24, 0  ;;  %p100_p1 = scmp.ne.s32.totalorder %s1523_s20, %s1519_s19 }
   0xa   : > { %p101_p2 = scmp.eq.s32.totalorder %s1527_s21, 0  ;;  %p106_p3 = scmp.ne.s32.totalorder %s1519_s19, %s1515_s18 }
   0xb   : > { %s1601_s26 = scalar_select %p91_p0, %s1523_s20, %s93_s25  }
   0xc   : > { %p1603_p4 = por %p101_p2, %p100_p1  ;;  %p1810_p5 = scmp.eq.s32.totalorder %s1588_s22, 0 }
   0xd   : > { %p1160_p6 = scmp.ge.s32.totalorder %s1527_s21, 1  ;;  %p164_p7 = scmp.lt.s32.totalorder %s1527_s21, 7 }
   0xe   : > { %p1612_p8 = por %p1810_p5, %p106_p3  ;;  %s177_s7 = sshll.u32 %s1803_s0, 4  ;;  %s178_s7 = int_to_ptr.vmem [resolvable:$true] %s177_s7 }
   0xf   : > { %p1617_p10 = pnand %p1160_p6, %p164_p7  ;;  %p1348_p12 = scmp.lt.s32.totalorder %s1527_s21, 6 }
  0x10   : > { %s1812_s28 = scalar_select %p1612_p8, 1, 0 }
  0x11   : > { %p1336_p11 = pneg %p1617_p10  ;;  %s1628_s8 = sand.u32 1, %s1523_s20  }
  0x12   : > { %p1638_p0 = pnand %p1348_p12, %p1603_p4  ;;  %s1163_s11 = sshll.u32 %s1628_s8, 4 }
  0x13   : > { %p1632_p13 = pnand %p1336_p11, %p1810_p5  ;;  %s1394_s12 = scalar_lea.vmem %s178_s7, 16 }
  0x14   : > { %p1395_p1 = scmp.ne.s32.totalorder %s178_s7, %s1394_s12  ;;  %p1402_p7 = scmp.lt.s32.totalorder %s178_s7, %s178_s7 }
  0x15   : > { %p1396_p2 = pneg %p1632_p13  ;;  %p1403_p9 = scmp.lt.s32.totalorder %s1394_s12, %s1394_s12 }
  0x17   : > { %p1397_p3 = pnand %p1396_p2, %p1395_p1  ;;  %p1404_p8 = por %p1403_p9, %p1402_p7 }
  0x19   : > { %p1398_p6 = pneg %p1397_p3 }
  0x1b   : > { %p1405_p11 = pnand %p1404_p8, %p1398_p6 }
  0x1d   : > { %1408 = shalt.err (!%p1405_p11)
}
  0x1e   : > { %s1529_s13 = smov [#allocation3]   ;;  %s1190_s14 = sshll.u32 %s1527_s21, 8 }
  0x1f   : > { %1339 = dma.vmem_to_smem (!%p1632_p13), %s178_s7, 16, %s1529_s13, [#allocation6]  }
  0x20   : > { %s1653_s17 = scalar_lea.hbm %s1806_s3, %s1190_s14  ;;  %s198_s18 = scalar_lea.vmem [#allocation7], %s1163_s11 }
  0x21   : > { %s205_s24 = sshll.u32 %s198_s18, 4  ;;  %s195_s25 = scalar_lea.sflag [#allocation4], %s1628_s8  ;;  %s1657_s24 = int_to_ptr.vmem [resolvable:$true] %s205_s24 }
  0x22   : > { %s1409_s27 = scalar_lea.hbm %s1653_s17, 256  ;;  %p1411_p8 = pneg %p1638_p0 }
  0x23   : > { %p1410_p4 = scmp.ne.s32.totalorder %s1653_s17, %s1409_s27  ;;  %s1414_s7 = scalar_lea.hbm %s1806_s3, 1536 }
  0x24   : > { %p1415_p13 = scmp.lt.u32.totalorder %s1653_s17, %s1806_s3  ;;  %p1416_p1 = scmp.lt.u32.totalorder %s1414_s7, %s1409_s27 }
  0x25   : > { %p1412_p9 = pnand %p1411_p8, %p1410_p4  ;;  %p1418_p3 = scmp.lt.u32.totalorder %s1409_s27, %s1653_s17 }
  0x26   : > { %p1417_p2 = por %p1416_p1, %p1415_p13 }
  0x27   : > { %p1413_p12 = pneg %p1412_p9 }
  0x28   : > { %p1419_p6 = por %p1418_p3, %p1417_p2 }
  0x2a   : > { %p1420_p7 = pnand %p1419_p6, %p1413_p12 }
  0x2c   : > { %1423 = shalt.err (!%p1420_p7)
}
  0x2d   : > { %s1424_s13 = scalar_lea.vmem %s1657_s24, 256  ;;  %s1530_s15 = smov [#allocation7]  }
  0x2e   : > { %p1425_p11 = scmp.ne.s32.totalorder %s1657_s24, %s1424_s13  ;;  %s1429_s16 = sshll.u32 %s1530_s15, 4  ;;  %s1430_s16 = int_to_ptr.vmem [resolvable:$false] %s1429_s16 }
  0x2f   : > { %s1431_s18 = scalar_lea.vmem %s1430_s16, 512  ;;  %p1432_p5 = scmp.lt.s32.totalorder %s1657_s24, %s1430_s16 }
  0x30   : > { %p1427_p4 = pnand %p1425_p11, %p1411_p8  ;;  %p1433_p13 = scmp.lt.s32.totalorder %s1431_s18, %s1424_s13 }
  0x32   : > { %p1428_p9 = pneg %p1427_p4  ;;  %p1434_p1 = por %p1433_p13, %p1432_p5 }
  0x34   : > { %p1435_p2 = pnand %p1434_p1, %p1428_p9 }
  0x36   : > { %1438 = shalt.err (!%p1435_p2)
}
  0x37   : > { %s1531_s27 = smov 128   ;;  %s1532_s30 = smov 8  }
  0x38   : > { %1343 = dma.hbm_to_vmem [thread:$0]  (!%p1638_p0), %s1653_s17, 256, %s1657_s24, %s195_s25, %s1531_s27, %s1531_s27, %s1532_s30  }
  0x39   : > { %s1695_s9 = scalar_lea.hbm %s1807_s4, %s1190_s14  ;;  %s219_s12 = scalar_lea.vmem [#allocation8], %s1163_s11 }
  0x3a   : > { %s226_s13 = sshll.u32 %s219_s12, 4  ;;  %s216_s15 = scalar_lea.sflag [#allocation9], %s1628_s8  ;;  %s1699_s13 = int_to_ptr.vmem [resolvable:$true] %s226_s13 }
  0x3b   : > { %s1439_s16 = scalar_lea.hbm %s1695_s9, 256  ;;  %s1444_s14 = scalar_lea.hbm %s1807_s4, 1536 }
  0x3c   : > { %p1440_p5 = scmp.ne.s32.totalorder %s1695_s9, %s1439_s16  ;;  %p1445_p6 = scmp.lt.u32.totalorder %s1695_s9, %s1807_s4 }
  0x3d   : > { %p1446_p7 = scmp.lt.u32.totalorder %s1444_s14, %s1439_s16  ;;  %p1448_p4 = scmp.lt.u32.totalorder %s1439_s16, %s1695_s9 }
  0x3e   : > { %p1442_p12 = pnand %p1440_p5, %p1411_p8 }
  0x3f   : > { %p1447_p11 = por %p1446_p7, %p1445_p6 }
  0x40   : > { %p1443_p3 = pneg %p1442_p12 }
  0x41   : > { %p1449_p9 = por %p1448_p4, %p1447_p11 }
  0x43   : > { %p1450_p13 = pnand %p1449_p9, %p1443_p3 }
  0x45   : > { %1453 = shalt.err (!%p1450_p13)
}
  0x46   : > { %s1454_s11 = scalar_lea.vmem %s1699_s13, 256  ;;  %s1533_s18 = smov [#allocation8]  }
  0x47   : > { %p1455_p1 = scmp.ne.s32.totalorder %s1699_s13, %s1454_s11  ;;  %s1459_s6 = sshll.u32 %s1533_s18, 4  ;;  %s1460_s6 = int_to_ptr.vmem [resolvable:$false] %s1459_s6 }
  0x48   : > { %s1461_s7 = scalar_lea.vmem %s1460_s6, 512  ;;  %p1462_p12 = scmp.lt.s32.totalorder %s1699_s13, %s1460_s6 }
  0x49   : > { %p1457_p2 = pnand %p1455_p1, %p1411_p8  ;;  %p1463_p6 = scmp.lt.s32.totalorder %s1461_s7, %s1454_s11 }
  0x4b   : > { %p1458_p5 = pneg %p1457_p2  ;;  %p1464_p7 = por %p1463_p6, %p1462_p12 }
  0x4d   : > { %p1465_p11 = pnand %p1464_p7, %p1458_p5 }
  0x4f   : > { %1468 = shalt.err (!%p1465_p11)
}
  0x50   : > { %1346 = dma.hbm_to_vmem [thread:$0]  (!%p1638_p0), %s1695_s9, 256, %s1699_s13, %s216_s15, %s1531_s27, %s1531_s27, %s1532_s30  }
  0x51   : > { %238 = sbr.rel (%p1617_p10) target bundleno = 804 (0x324), region = 40  ;;  %p1816_p8 = scmp.eq.s32.totalorder (!%p1617_p10), %s1588_s22, 0 }
  0x58   : > { %1498 = dma.done.wait (%p1816_p8), [#allocation6], 16   ;;  %p1817_p3 = pmov %p1816_p8 }
  0x59   : > { %s244_s10 = sand.u32 1, %s1519_s19   ;;  %p1818_p4 = scmp.ne.s32.totalorder %s1812_s28, 0 }
  0x5a   : > { %1500 = vsyncadd (%p1817_p3), [#allocation6], 4294967280  ;;  %s1171_s12 = sshll.u32 %s244_s10, 4  ;;  %s245_s16 = scalar_lea.sflag [#allocation4], %s244_s10 }
  0x5b   : > { %s248_s21 = scalar_lea.vmem [#allocation7], %s1171_s12 }
  0x5c   : > { %1502 = dma.done.wait (%p1818_p4), %s245_s16, 256  }
  0x5d   : > { %1504 = vsyncadd (%p1818_p4), %s245_s16, 4294967040  ;;  %s254_s29 = scalar_lea.sflag [#allocation9], %s244_s10  ;;  %s257_s8 = scalar_lea.vmem [#allocation8], %s1171_s12 }
  0x5e   : > { %1506 = dma.done.wait (%p1818_p4), %s254_s29, 256  }
  0x5f   : > { %1508 = vsyncadd (%p1818_p4), %s254_s29, 4294967040 }
  0x60   : > { %262 = sfence }
  0x61   : > { %p1819_p10 = scmp.ne.s32.totalorder %s1588_s22, 0 }
  0x62   : > { %vm289_vm0 = vcmask (!%p1819_p10), 46080   ;;  %v1534_v0 = vmov (!%p1819_p10), 0.0  }
  0x63   : > { %288 = sbr.rel (%p1819_p10) target bundleno = 106 (0x6a), region = 56  ;;  %290 = vst.msk [vmem:[#allocation2] sm:$0x3f] (!%p1819_p10), %vm289_vm0, %v1534_v0 }
  0x6a PF: > { %v296_v1 = vld [vmem:[%s248_s21] sm:$0xff]  ;;  %v297_v2 = vld [vmem:[%s248_s21 + $0x8] sm:$0xff]  ;;  %v1535_v4 = vmov 0.0|0.0   ;;  %vm1536_vm1 = vmmov 0   ;;  %v1537_v9 = vmov 0.0   ;;  %vm300_vm2 = vcmask 130048  }
  0x6b   : > { %v298_v3 = vld [vmem:[%s257_s8] sm:$0xff]  ;;  %1292 = vmatprep.subr.bf16.mxu0 %v1535_v4  ;;  %v299_v5 = vld [vmem:[%s257_s8 + $0x8] sm:$0xff]  ;;  %v1293_v6 = vpack.c.bf16 %v297_v2, %v296_v1  ;;  %v590_v8 = vmul.f32 %v296_v1, %v296_v1  ;;  %1226 = vmatprep.mubr.msk.f32.mxu0 %vm1536_vm1, %v1537_v9  ;;  %v591_v11 = vmul.f32 %v297_v2, %v297_v2  ;;  %s291_s17 = sld [smem:[#allocation3]]  ;;  %s1174_s14 = sld [smem:[#allocation3 + $0x1]]  ;;  %vm1047_vm3 = vcmask 46080  }
  0x6c   : > { %v294_v7 = vld [vmem:[%s1805_s2] sm:$0xff]  ;;  %1295 = vmatprep.subr.bf16.mxu1 %v1535_v4  ;;  %v295_v10 = vld [vmem:[%s1805_s2 + $0x8] sm:$0xff]  ;;  %v1299_v13 = vpack.c.bf16 %v299_v5, %v298_v3  ;;  %1233 = vmatprep.mubr.msk.f32.mxu1 %vm1536_vm1, %v1537_v9  ;;  %v735_v16 = vmul.f32 %v298_v3, %v298_v3  ;;  %v736_v17 = vmul.f32 %v299_v5, %v299_v5  ;;  %p1185_p0 = scmp.ne.s32.totalorder %s1588_s22, 5 }
  0x6d   : > { %1294 = vmatpush3.bf16.msra.mxu0 %v1293_v6  ;;  %v293_v12 = vld [vmem:[%s1804_s1] sm:$0x3f]  ;;  %v1296_v14 = vpack.c.bf16 %v295_v10, %v294_v7  ;;  %v1305_v15 = vpack.c.bf16 %v591_v11, %v590_v8  ;;  %v880_v18 = vmul.f32 %v298_v3, %v296_v1  ;;  %v881_v19 = vmul.f32 %v299_v5, %v297_v2 }
  0x6e   : > { %1298 = vmatprep.subr.bf16.mxu0 %v1535_v4  ;;  %v1311_v20 = vpack.c.bf16 %v736_v17, %v735_v16  ;;  %v1045_v61 = vld [vmem:[#allocation2] sm:$0x3f] }
  0x6f   : > { %1297 = vmatpush3.bf16.msra.mxu1 %v1296_v14  ;;  %v1317_v21 = vpack.c.bf16 %v881_v19, %v880_v18 }
  0x70   : > { %1227 = vmatmul.mubr.msk.f32.vlgmr.msra.gmra.mrb[0].mxu0 %vm300_vm2, %v293_v12  ;;  %1301 = vmatprep.subr.bf16.mxu1 %v1535_v4 }
  0x71   : > { %1300 = vmatpush3.bf16.msra.mxu0 %v1299_v13  ;;  %1240 = vmatprep.mubr.msk.f32.mxu0 %vm1536_vm1, %v1537_v9  ;;  %v1037_v46 = vstv %s291_s17  ;;  %v1032_v47 = vstv %s1174_s14 }
  0x72   : > { %1304 = vmatprep.subr.bf16.mxu0 %v1535_v4 }
  0x74   : > { %1241 = vmatmul.mubr.msk.f32.vlgmr.msra.gmra.mrb[2].mxu0 %vm300_vm2, %v293_v12 }
  0x75   : > { %1306 = vmatpush3.bf16.msra.mxu0 %v1305_v15  ;;  %1254 = vmatprep.mubr.msk.f32.mxu0 %vm1536_vm1, %v1537_v9 }
  0x76   : > { %1310 = vmatprep.subr.bf16.mxu0 %v1535_v4 }
  0x78   : > { %1255 = vmatmul.mubr.msk.f32.vlgmr.msra.gmra.mrb[4].mxu0 %vm300_vm2, %v293_v12 }
  0x79   : > { %1312 = vmatpush3.bf16.msra.mxu0 %v1311_v20  ;;  %1268 = vmatprep.mubr.msk.f32.mxu0 %vm1536_vm1, %v1537_v9 }
  0x7a   : > { %1316 = vmatprep.subr.bf16.mxu0 %v1535_v4 }
  0x7c   : > { %1269 = vmatmul.mubr.msk.f32.vlgmr.msra.gmra.mrb[6].mxu0 %vm300_vm2, %v293_v12 }
  0x7d   : > { %1318 = vmatpush3.bf16.msra.mxu0 %v1317_v21  ;;  %1282 = vmatprep.mubr.msk.f32.mxu0 %vm1536_vm1, %v1537_v9 }
  0x80   : > { %1283 = vmatmul.mubr.msk.f32.vlgmr.msra.gmra.mrb[8].mxu0 %vm300_vm2, %v293_v12 }
 0x143   : > { %v370_v22 = vpop.f32.mrb[0].mxu0 }
 0x144   : > { %v1228_v23 = vpop.f32.mrb[1].mxu0  ;;  %1234 = vmatmul.mubr.msk.f32.vlgmr.msra.gmra.mrb[0].mxu1 %vm300_vm2, %v370_v22 }
 0x145   : > { %1303 = vmatpush3.bf16.msra.mxu1 %v1296_v14  ;;  %1247 = vmatprep.mubr.msk.f32.mxu1 %vm1536_vm1, %v1537_v9 }
 0x146   : > { %1307 = vmatprep.subr.bf16.mxu1 %v1535_v4 }
 0x147   : > { %v513_v24 = vpop.f32.mrb[2].mxu0 }
 0x148   : > { %v1242_v25 = vpop.f32.mrb[3].mxu0  ;;  %1248 = vmatmul.mubr.msk.f32.vlgmr.msra.gmra.mrb[2].mxu1 %vm300_vm2, %v513_v24 }
 0x149   : > { %1309 = vmatpush3.bf16.msra.mxu1 %v1296_v14  ;;  %1261 = vmatprep.mubr.msk.f32.mxu1 %vm1536_vm1, %v1537_v9 }
 0x14a   : > { %1313 = vmatprep.subr.bf16.mxu1 %v1535_v4 }
 0x14b   : > { %v658_v26 = vpop.f32.mrb[4].mxu0 }
 0x14c   : > { %v1256_v27 = vpop.f32.mrb[5].mxu0  ;;  %1262 = vmatmul.mubr.msk.f32.vlgmr.msra.gmra.mrb[4].mxu1 %vm300_vm2, %v658_v26 }
 0x14d   : > { %1315 = vmatpush3.bf16.msra.mxu1 %v1296_v14  ;;  %1275 = vmatprep.mubr.msk.f32.mxu1 %vm1536_vm1, %v1537_v9 }
 0x14e   : > { %1319 = vmatprep.subr.bf16.mxu1 %v1535_v4 }
 0x14f   : > { %v803_v28 = vpop.f32.mrb[6].mxu0 }
 0x150   : > { %v1270_v29 = vpop.f32.mrb[7].mxu0  ;;  %1276 = vmatmul.mubr.msk.f32.vlgmr.msra.gmra.mrb[6].mxu1 %vm300_vm2, %v803_v28 }
 0x151   : > { %1321 = vmatpush3.bf16.msra.mxu1 %v1296_v14  ;;  %1289 = vmatprep.mubr.msk.f32.mxu1 %vm1536_vm1, %v1537_v9 }
 0x153   : > { %v948_v30 = vpop.f32.mrb[8].mxu0 }
 0x154   : > { %1290 = vmatmul.mubr.msk.f32.vlgmr.msra.gmra.mrb[8].mxu1 %vm300_vm2, %v948_v30  ;;  %v1284_v31 = vpop.f32.mrb[9].mxu0 }
 0x217   : > { %v443_v32 = vpop.f32.mrb[0].mxu1 }
 0x218   : > { %v1235_v33 = vpop.f32.mrb[1].mxu1  ;;  %v1025_v35 = vmul.f32 %v443_v32, %v443_v32 }
 0x21b   : > { %v586_v34 = vpop.f32.mrb[2].mxu1 }
 0x21c   : > { %v1026_v36 = vmul.f32 %v586_v34, %v586_v34  ;;  %v1027_v37 = vmul.f32 %v586_v34, %v443_v32  ;;  %v1249_v38 = vpop.f32.mrb[3].mxu1 }
 0x21e   : > { %v1040_v39 = vadd.f32 %v1026_v36, %v1025_v35  ;;  %v1036_v50 = vmul.f32 2.0, %v1027_v37 }
 0x21f   : > { %v731_v40 = vpop.f32.mrb[4].mxu1 }
 0x220   : > { %v1028_v41 = vsub.f32 %v731_v40, %v1025_v35  ;;  %v1263_v42 = vpop.f32.mrb[5].mxu1  ;;  %v1041_v51 = vadd.f32 %v1040_v39, %v1037_v46  ;;  %v1038_v57 = vadd.f32 %v1037_v46, %v1036_v50 }
 0x223   : > { %v876_v43 = vpop.f32.mrb[6].mxu1 }
 0x224   : > { %v1029_v44 = vsub.f32 %v876_v43, %v1026_v36  ;;  %v1277_v45 = vpop.f32.mrb[7].mxu1 }
 0x226   : > { %v1034_v48 = vadd.f32 %v1029_v44, %v1028_v41 }
 0x227   : > { %v1021_v49 = vpop.f32.mrb[8].mxu1 }
 0x228   : > { %v1030_v52 = vsub.f32 %v1021_v49, %v1027_v37  ;;  %v1035_v53 = vadd.f32 %v1034_v48, %v1032_v47  ;;  %v1291_v54 = vpop.f32.mrb[9].mxu1 }
 0x22a   : > { %v1031_v55 = vmul.f32 2.0, %v1030_v52  ;;  %v1042_v56 = vmul.f32 %v1041_v51, %v1035_v53 }
 0x22c   : > { %v1033_v58 = vadd.f32 %v1032_v47, %v1031_v55  ;;  %1392 = vrcp.f32 %v1042_v56 }
 0x22e   : > { %v1039_v59 = vmul.f32 %v1038_v57, %v1033_v58 }
 0x235   : > { %1052 = sbr.rel (%p1185_p0) target bundleno = 789 (0x315), region = 60 }
 0x236   : > { %v1393_v60 = vpop.eup %1392 }
 0x237   : > { %v1044_v62 = vmul.f32 %v1393_v60, %v1039_v59 }
 0x239   : > { %v1046_v63 = vadd.f32 %v1045_v61, %v1044_v62 }
 0x23b   : > { %1048 = vst.msk [vmem:[#allocation2] sm:$0x3f] %vm1047_vm3, %v1046_v63 }
 0x242   : > { %v1053_v0 = vld [vmem:[#allocation2] sm:$0x3f] }
 0x243   : > { %v1054_v1 = vsel %vm1047_vm3, %v1053_v0, 0.0 }
 0x244   : > { %1055 = vadd.xlane.f32.xlu0 %v1054_v1 }
 0x2d1   : > { %v1056_v2 = vpop.xlane.xlu0 %1055 }
 0x2d2   : > { %v1057_v3 = vrot.slane %v1056_v2, 4 }
 0x2d4   : > { %v1058_v4 = vadd.f32 %v1057_v3, %v1056_v2 }
 0x2d6   : > { %v1059_v5 = vrot.slane %v1058_v4, 2 }
 0x2d8   : > { %v1060_v6 = vadd.f32 %v1059_v5, %v1058_v4 }
 0x2da   : > { %v1061_v7 = vrot.slane %v1060_v6, 1 }
 0x2dc   : > { %v1062_v8 = vadd.f32 %v1061_v7, %v1060_v6 }
 0x2de   : > { %1322 = vpush %v1062_v8 }
 0x30f   : > { %s1323_s24 = spop %1322 }
 0x310   : > { %s1064_s25 = smul.f32 0.0046296297, %s1323_s24 }
 0x312   : > { %s1065_s11 = ssub.f32 1.0, %s1064_s25 }
 0x314   : > { %1067 = sst [smem:[#allocation10]] %s1065_s11 }
 0x315 PF: > { %p1350_p9 = scmp.eq.s32.totalorder %s1588_s22, 5  ;;  %s1469_s7 = scalar_lea.hbm %s1808_s5, 16 }
 0x316   : > { %p1470_p13 = scmp.ne.s32.totalorder %s1808_s5, %s1469_s7  ;;  %p1475_p5 = scmp.lt.u32.totalorder %s1469_s7, %s1808_s5 }
 0x318   : > { %p1471_p1 = pnand %p1470_p13, %p1350_p9 }
 0x31a   : > { %p1472_p2 = pneg %p1471_p1 }
 0x31c   : > { %p1477_p12 = pnand %p1475_p5, %p1472_p2 }
 0x31e   : > { %1480 = shalt.err (!%p1477_p12)
}
 0x31f   : > { %s1538_s29 = smov [#allocation10]  }
 0x320   : > { %1333 = dma.smem_to_hbm (%p1350_p9), %s1538_s29, 16, %s1808_s5, [#allocation5]  }
 0x321   : > { %1510 = dma.done.wait (%p1350_p9), [#allocation5], 16  }
 0x322   : > { %1512 = vsyncadd (%p1350_p9), [#allocation5], 4294967280 }
 0x323   : > { %1081 = sfence }
 0x324 PF: > { %p20_p6 = scmp.ge.s32.totalorder %s1591_s23, 8   ;;  %s1820_s18 = smov %s1519_s19 }
 0x325   : > { %s1821_s19 = smov %s1523_s20  ;;  %s1822_s20 = smov %s1601_s26 }
 0x326   : > { %s1823_s21 = smov %s1591_s23  ;;  %22 = sbr.rel (!%p20_p6) target bundleno = 7 (0x7), region = 104 }
 0x32d   :  { %1087 = vsyncpa [#allocation4], 1 }
 0x32e   :  { %1089 = vsyncpa [#allocation4 + $0x1], 1 }
 0x32f   :  { %1090 = vsyncpa [#allocation9], 1 }
 0x330   :  { %1092 = vsyncpa [#allocation9 + $0x1], 1 }
 0x331   :  { %1093 = vsyncpa [#allocation5], 1 }
 0x332   :  { %1095 = vsyncpa [#allocation5 + $0x1], 1 }
 0x333   :  { %1096 = vsyncpa [#allocation6], 1 }
 0x334   :  { %1098 = vsyncpa [#allocation6 + $0x1], 1 }

</bundles_post_ra>
